<compile_context>
chip_gen: v7x
topology: tpu7x:2x2x1
jax: 0.10.0
libtpu: 0.0.40
codegen_flags: <defaults>
</compile_context>

<pallas_src>
import math

import jax
import jax.numpy as jnp
from jax.experimental import pallas as pl
from jax.experimental.pallas import tpu as pltpu

EPS = 1e-6                        # FFNLayerNorm default eps in the PyTorch module
_INV_SQRT2 = 1.0 / math.sqrt(2.0)
_MAX_TB = 32                      # samples folded per grid step; caps the block-diag
                                  # Linear weight at TB*TB*L*O*4 bytes of VMEM


def _ffn_kernel(x_ref, p_ref, w1_ref, w2_ref, wbig_ref, o_ref):
    C = x_ref.shape[0]
    H = w1_ref.shape[0]

    x = x_ref[...].astype(jnp.float32)                     # (C, TB*L); lanes = batch*length

    # Packed per-channel params (resident in VMEM): [ln_w, ln_b, b_conv1, b_conv2].
    lnw = p_ref[0:C, :]                                    # (C, 1)
    lnb = p_ref[C:2 * C, :]                                # (C, 1)
    b1 = p_ref[2 * C:2 * C + H, :]                         # (H, 1)
    b2 = p_ref[2 * C + H:3 * C + H, :]                     # (C, 1)

    # FFNLayerNorm: mean/var over the channel (sublane) axis.
    u = jnp.mean(x, axis=0, keepdims=True)                 # (1, TB*L)
    s = jnp.mean((x - u) ** 2, axis=0, keepdims=True)      # (1, TB*L)
    xn = (x - u) * jax.lax.rsqrt(s + EPS)                  # (C, TB*L)
    xn = lnw * xn + lnb

    # 1x1 Conv1d C -> H (single lane-dense MXU matmul), then exact (erf) GELU.
    h = jnp.dot(w1_ref[...], xn, preferred_element_type=jnp.float32) + b1   # (H, TB*L)
    h = 0.5 * h * (1.0 + jax.lax.erf(h * _INV_SQRT2))       # nn.GELU() exact

    # 1x1 Conv1d H -> C.
    y = jnp.dot(w2_ref[...], h, preferred_element_type=jnp.float32) + b2    # (C, TB*L)

    # nn.Linear over the length axis (no bias), all TB samples in one MXU op:
    # (C, TB*L) @ blockdiag_TB(W_lin^T) -> (C, TB*O)  — dense lane-full output slab.
    out = jnp.dot(y, wbig_ref[...], preferred_element_type=jnp.float32)

    # TODO(synk): nn.Dropout is identity in eval mode; training-mode dropout not implemented.
    o_ref[...] = out.astype(o_ref.dtype)


def _pick_tb(B, L, O, max_tb=_MAX_TB):
    """Number of batch elements folded into each grid step."""
    if B <= max_tb:
        return B                           # single grid step; blocks equal full array dims
    # For partial blocks the lane dims (TB*L input, TB*O output) must be multiples of 128.
    valid = [tb for tb in range(1, max_tb + 1)
             if B % tb == 0 and (tb * L) % 128 == 0 and (tb * O) % 128 == 0]
    if valid:
        even = [tb for tb in valid if (B // tb) % 2 == 0]   # keep grid even for v7x's 2 TCs
        return max(even) if even else max(valid)
    # TODO(synk): pad the batch when B is large and has no 128-lane-compatible divisor.
    return B


def ffn_forward(x_ncl, ln_w, ln_b, w_conv1, b_conv1, w_conv2, b_conv2, w_lin):
    """x_ncl: (B, C, L) float32.  Returns (B, C, out_dim) matching the PyTorch module."""
    B, C, L = x_ncl.shape
    H = w_conv1.shape[0]                   # in_channel * expansion_ratio
    O = w_lin.shape[0]                     # out_dim
    TB = _pick_tb(B, L, O)
    G = B // TB

    # One-time weight / layout plumbing (tiny arrays, single XLA ops).
    w1 = w_conv1[:, :, 0]                                       # (H, C)
    w2 = w_conv2[:, :, 0]                                       # (C, H)
    wlt = jnp.transpose(w_lin, (1, 0))                          # (L, O)
    wbig = jnp.kron(jnp.eye(TB, dtype=x_ncl.dtype), wlt)        # (TB*L, TB*O) block-diag
    params = jnp.concatenate(
        [ln_w.reshape(C, 1), ln_b.reshape(C, 1),
         b_conv1.reshape(H, 1), b_conv2.reshape(C, 1)], axis=0)  # (3C+H, 1)

    # Channel-major 2D view: lanes carry (batch, length) -> lane-dense compute per step.
    x2 = jnp.transpose(x_ncl, (1, 0, 2)).reshape(C, B * L)      # (C, B*L)

    # Advisory cost estimate so XLA schedules neighbors around the custom call.
    flops = int(G * (2 * H * C * TB * L + 2 * C * H * TB * L
                     + 2 * C * (TB * L) * (TB * O) + 12 * C * TB * L))
    bytes_accessed = int(4 * (C * B * L + C * B * O + H * C + C * H
                              + TB * L * TB * O + 3 * C + H))
    cost = pl.CostEstimate(flops=flops, transcendentals=int(B * H * L),
                           bytes_accessed=bytes_accessed)

    out2d = pl.pallas_call(
        _ffn_kernel,
        out_shape=jax.ShapeDtypeStruct((C, B * O), x_ncl.dtype),
        grid_spec=pltpu.PrefetchScalarGridSpec(
            num_scalar_prefetch=0,
            grid=(G,),
            in_specs=[
                pl.BlockSpec((C, TB * L), lambda i: (0, i)),       # x tile (TB samples)
                pl.BlockSpec((3 * C + H, 1), lambda i: (0, 0)),    # packed params (resident)
                pl.BlockSpec((H, C), lambda i: (0, 0)),            # conv1 weight (resident)
                pl.BlockSpec((C, H), lambda i: (0, 0)),            # conv2 weight (resident)
                pl.BlockSpec((TB * L, TB * O), lambda i: (0, 0)),  # block-diag Linear weight
            ],
            out_specs=pl.BlockSpec((C, TB * O), lambda i: (0, i)),  # dense output slab
        ),
        compiler_params=pltpu.CompilerParams(
            dimension_semantics=("parallel",)),
        cost_estimate=cost,
    )(x2, params, w1, w2, wbig)

    # (C, B*O) -> (B, C, out_dim); tiny one-time re-layout outside the kernel.
    return jnp.transpose(out2d.reshape(C, B, O), (1, 0, 2))


def _reference(x, ln_w, ln_b, w_conv1, b_conv1, w_conv2, b_conv2, w_lin):
    """Pure-JAX reference mirroring the PyTorch forward (eval mode)."""
    u = x.mean(axis=1, keepdims=True)
    s = ((x - u) ** 2).mean(axis=1, keepdims=True)
    xn = (x - u) / jnp.sqrt(s + EPS)
    xn = ln_w.reshape(1, -1, 1) * xn + ln_b.reshape(1, -1, 1)
    h = jnp.einsum('hc,bcl->bhl', w_conv1[:, :, 0], xn) + b_conv1[None, :, None]
    h = 0.5 * h * (1.0 + jax.lax.erf(h * _INV_SQRT2))
    y = jnp.einsum('ch,bhl->bcl', w_conv2[:, :, 0], h) + b_conv2[None, :, None]
    out = jnp.einsum('ol,bcl->bco', w_lin, y)
    return out


if __name__ == "__main__":
    # FFN(in_dim=16, in_channel=4, dropout=0.0, out_dim=8, expansion_ratio=4)
    B, C, L = 2, 4, 16
    expansion = 4
    H = C * expansion
    out_dim = 8

    key = jax.random.PRNGKey(0)
    k = jax.random.split(key, 8)
    x = jax.random.normal(k[0], (B, C, L), dtype=jnp.float32)          # NCL input
    ln_w = 1.0 + 0.1 * jax.random.normal(k[1], (1, C), dtype=jnp.float32)
    ln_b = 0.1 * jax.random.normal(k[2], (1, C), dtype=jnp.float32)
    w_conv1 = 0.2 * jax.random.normal(k[3], (H, C, 1), dtype=jnp.float32)
    b_conv1 = 0.1 * jax.random.normal(k[4], (H,), dtype=jnp.float32)
    w_conv2 = 0.2 * jax.random.normal(k[5], (C, H, 1), dtype=jnp.float32)
    b_conv2 = 0.1 * jax.random.normal(k[6], (C,), dtype=jnp.float32)
    w_lin = 0.2 * jax.random.normal(k[7], (out_dim, L), dtype=jnp.float32)

    out = ffn_forward(x, ln_w, ln_b, w_conv1, b_conv1, w_conv2, b_conv2, w_lin)
    out = jax.block_until_ready(out)

    ref = _reference(x, ln_w, ln_b, w_conv1, b_conv1, w_conv2, b_conv2, w_lin)
    assert out.shape == (B, C, out_dim), out.shape
    assert jnp.allclose(out, ref, atol=1e-5, rtol=1e-5), \
        float(jnp.max(jnp.abs(out - ref)))

    print("KERNEL_OK")
</pallas_src>

<mosaic_0001>
module attributes {stable_mosaic.version = 11 : i64} {
  func.func @_ffn_kernel(%arg0: i32, %arg1: memref<4x32xf32, #tpu.memory_space<vmem>>, %arg2: memref<28x1xf32, #tpu.memory_space<vmem>>, %arg3: memref<16x4xf32, #tpu.memory_space<vmem>>, %arg4: memref<4x16xf32, #tpu.memory_space<vmem>>, %arg5: memref<32x16xf32, #tpu.memory_space<vmem>>, %arg6: memref<4x16xf32, #tpu.memory_space<vmem>>) attributes {dimension_semantics = [#tpu.dimension_semantics<parallel>], iteration_bounds = array<i64: 1>, scalar_prefetch = 0 : i64, scratch_operands = 0 : i64, tpu.core_type = #tpu.core_type<tc>, window_params = [{transform_indices = @transform_0, window_bounds = array<i64: 4, 32>}, {pipeline_mode = #tpu.pipeline_mode<synchronous>, transform_indices = @transform_1, window_bounds = array<i64: 28, 1>}, {pipeline_mode = #tpu.pipeline_mode<synchronous>, transform_indices = @transform_2, window_bounds = array<i64: 16, 4>}, {pipeline_mode = #tpu.pipeline_mode<synchronous>, transform_indices = @transform_3, window_bounds = array<i64: 4, 16>}, {pipeline_mode = #tpu.pipeline_mode<synchronous>, transform_indices = @transform_4, window_bounds = array<i64: 32, 16>}, {transform_indices = @transform_5, window_bounds = array<i64: 4, 16>}]} {
    %c0 = arith.constant 0 : index
    %c0_0 = arith.constant 0 : index
    %0 = vector.load %arg1[%c0, %c0_0] : memref<4x32xf32, #tpu.memory_space<vmem>>, vector<4x32xf32>
    %c0_1 = arith.constant 0 : index
    %c0_2 = arith.constant 0 : index
    %1 = vector.load %arg2[%c0_1, %c0_2] : memref<28x1xf32, #tpu.memory_space<vmem>>, vector<4x1xf32>
    %c4 = arith.constant 4 : index
    %c0_3 = arith.constant 0 : index
    %2 = vector.load %arg2[%c4, %c0_3] : memref<28x1xf32, #tpu.memory_space<vmem>>, vector<4x1xf32>
    %c8 = arith.constant 8 : index
    %c0_4 = arith.constant 0 : index
    %3 = vector.load %arg2[%c8, %c0_4] : memref<28x1xf32, #tpu.memory_space<vmem>>, vector<16x1xf32>
    %c24 = arith.constant 24 : index
    %c0_5 = arith.constant 0 : index
    %4 = vector.load %arg2[%c24, %c0_5] : memref<28x1xf32, #tpu.memory_space<vmem>>, vector<4x1xf32>
    %cst = arith.constant dense<0.000000e+00> : vector<32xf32>
    %5 = vector.multi_reduction <add>, %0, %cst [0] : vector<4x32xf32> to vector<32xf32>
    %6 = vector.shape_cast %5 : vector<32xf32> to vector<1x32xf32>
    %cst_6 = arith.constant 4.000000e+00 : f32
    %7 = vector.broadcast %cst_6 : f32 to vector<1x32xf32>
    %8 = arith.divf %6, %7 : vector<1x32xf32>
    %9 = vector.broadcast %8 : vector<1x32xf32> to vector<4x32xf32>
    %10 = arith.subf %0, %9 : vector<4x32xf32>
    %11 = arith.mulf %10, %10 : vector<4x32xf32>
    %cst_7 = arith.constant dense<0.000000e+00> : vector<32xf32>
    %12 = vector.multi_reduction <add>, %11, %cst_7 [0] : vector<4x32xf32> to vector<32xf32>
    %13 = vector.shape_cast %12 : vector<32xf32> to vector<1x32xf32>
    %cst_8 = arith.constant 4.000000e+00 : f32
    %14 = vector.broadcast %cst_8 : f32 to vector<1x32xf32>
    %15 = arith.divf %13, %14 : vector<1x32xf32>
    %16 = vector.broadcast %8 : vector<1x32xf32> to vector<4x32xf32>
    %17 = arith.subf %0, %16 : vector<4x32xf32>
    %cst_9 = arith.constant 9.99999997E-7 : f32
    %18 = vector.broadcast %cst_9 : f32 to vector<1x32xf32>
    %19 = arith.addf %15, %18 : vector<1x32xf32>
    %20 = math.rsqrt %19 : vector<1x32xf32>
    %21 = vector.broadcast %20 : vector<1x32xf32> to vector<4x32xf32>
    %22 = arith.mulf %17, %21 : vector<4x32xf32>
    %23 = vector.broadcast %1 : vector<4x1xf32> to vector<4x32xf32>
    %24 = arith.mulf %23, %22 : vector<4x32xf32>
    %25 = vector.broadcast %2 : vector<4x1xf32> to vector<4x32xf32>
    %26 = arith.addf %24, %25 : vector<4x32xf32>
    %c0_10 = arith.constant 0 : index
    %c0_11 = arith.constant 0 : index
    %27 = vector.load %arg3[%c0_10, %c0_11] : memref<16x4xf32, #tpu.memory_space<vmem>>, vector<16x4xf32>
    %cst_12 = arith.constant dense<0.000000e+00> : vector<16x32xf32>
    %28 = tpu.matmul %27, %26, %cst_12 {dimension_numbers = #tpu.dot_dimension_numbers<[1], [0], [0], [1], [0, 0, 1, 1], [], []>} : vector<16x4xf32>, vector<4x32xf32>, vector<16x32xf32> -> vector<16x32xf32>
    %29 = vector.broadcast %3 : vector<16x1xf32> to vector<16x32xf32>
    %30 = arith.addf %28, %29 : vector<16x32xf32>
    %cst_13 = arith.constant 5.000000e-01 : f32
    %31 = vector.broadcast %cst_13 : f32 to vector<16x32xf32>
    %32 = arith.mulf %31, %30 : vector<16x32xf32>
    %cst_14 = arith.constant 0.707106769 : f32
    %33 = vector.broadcast %cst_14 : f32 to vector<16x32xf32>
    %34 = arith.mulf %30, %33 : vector<16x32xf32>
    %35 = math.erf %34 : vector<16x32xf32>
    %cst_15 = arith.constant 1.000000e+00 : f32
    %36 = vector.broadcast %cst_15 : f32 to vector<16x32xf32>
    %37 = arith.addf %36, %35 : vector<16x32xf32>
    %38 = arith.mulf %32, %37 : vector<16x32xf32>
    %c0_16 = arith.constant 0 : index
    %c0_17 = arith.constant 0 : index
    %39 = vector.load %arg4[%c0_16, %c0_17] : memref<4x16xf32, #tpu.memory_space<vmem>>, vector<4x16xf32>
    %cst_18 = arith.constant dense<0.000000e+00> : vector<4x32xf32>
    %40 = tpu.matmul %39, %38, %cst_18 {dimension_numbers = #tpu.dot_dimension_numbers<[1], [0], [0], [1], [0, 0, 1, 1], [], []>} : vector<4x16xf32>, vector<16x32xf32>, vector<4x32xf32> -> vector<4x32xf32>
    %41 = vector.broadcast %4 : vector<4x1xf32> to vector<4x32xf32>
    %42 = arith.addf %40, %41 : vector<4x32xf32>
    %c0_19 = arith.constant 0 : index
    %c0_20 = arith.constant 0 : index
    %43 = vector.load %arg5[%c0_19, %c0_20] : memref<32x16xf32, #tpu.memory_space<vmem>>, vector<32x16xf32>
    %cst_21 = arith.constant dense<0.000000e+00> : vector<4x16xf32>
    %44 = tpu.matmul %42, %43, %cst_21 {dimension_numbers = #tpu.dot_dimension_numbers<[1], [0], [0], [1], [0, 0, 1, 1], [], []>} : vector<4x32xf32>, vector<32x16xf32>, vector<4x16xf32> -> vector<4x16xf32>
    %c0_22 = arith.constant 0 : index
    %c0_23 = arith.constant 0 : index
    %45 = vector.load %arg6[%c0_22, %c0_23] : memref<4x16xf32, #tpu.memory_space<vmem>>, vector<4x16xf32>
    tpu.vector_store %arg6[%c0_22, %c0_23], %44 {strides = array<i32>} : memref<4x16xf32, #tpu.memory_space<vmem>>, vector<4x16xf32>,
    return
  }
  func.func @transform_0(%arg0: i32) -> (i32, i32) {
    %c0_i32 = arith.constant 0 : i32
    %c0_i32_0 = arith.constant 0 : i32
    return %c0_i32, %arg0 : i32, i32
  }
  func.func @transform_1(%arg0: i32) -> (i32, i32) {
    %c0_i32 = arith.constant 0 : i32
    %c0_i32_0 = arith.constant 0 : i32
    %c0_i32_1 = arith.constant 0 : i32
    return %c0_i32, %c0_i32_0 : i32, i32
  }
  func.func @transform_2(%arg0: i32) -> (i32, i32) {
    %c0_i32 = arith.constant 0 : i32
    %c0_i32_0 = arith.constant 0 : i32
    %c0_i32_1 = arith.constant 0 : i32
    return %c0_i32, %c0_i32_0 : i32, i32
  }
  func.func @transform_3(%arg0: i32) -> (i32, i32) {
    %c0_i32 = arith.constant 0 : i32
    %c0_i32_0 = arith.constant 0 : i32
    %c0_i32_1 = arith.constant 0 : i32
    return %c0_i32, %c0_i32_0 : i32, i32
  }
  func.func @transform_4(%arg0: i32) -> (i32, i32) {
    %c0_i32 = arith.constant 0 : i32
    %c0_i32_0 = arith.constant 0 : i32
    %c0_i32_1 = arith.constant 0 : i32
    return %c0_i32, %c0_i32_0 : i32, i32
  }
  func.func @transform_5(%arg0: i32) -> (i32, i32) {
    %c0_i32 = arith.constant 0 : i32
    %c0_i32_0 = arith.constant 0 : i32
    return %c0_i32, %arg0 : i32, i32
  }
}

</mosaic_0001>

<bundles_post_ra>
// kernel: tpu_custom_call.1
= control target key start
LH: loop header
LB: loop body
LE: loop exit
PB: predicated region body
PF: predicated region fallthrough
CT: control target
= control target key end

     0   :  { %v429_v1 = vmov 0   ;;  %s517_s0 = inlined_call_operand.vmem [shape: f32[4,32], index: 0, kind: input, shape index: {}]   ;;  %s518_s1 = inlined_call_operand.vmem [shape: f32[28,1], index: 1, kind: input, shape index: {}]   ;;  %s519_s2 = inlined_call_operand.vmem [shape: f32[16,4], index: 2, kind: input, shape index: {}]   ;;  %s520_s3 = inlined_call_operand.vmem [shape: f32[4,16], index: 3, kind: input, shape index: {}]   ;;  %s521_s4 = inlined_call_operand.vmem [shape: f32[32,16], index: 4, kind: input, shape index: {}]   ;;  %s522_s5 = inlined_call_operand.hbm [shape: f32[4,16], index: 5, kind: output, shape index: {}]  }
   0x1   :  { %v22_v0 = vld [vmem:[%s518_s1] sm:$0xf]  ;;  %397 = vset.pattern.permute.xlu0 %v429_v1  ;;  %398 = vset.pattern.permute.xlu1 %v429_v1 }
   0x2   :  { %10 = vsyncpa [#allocation3], 0  ;;  %52 = vperm.xlu0 %397, %v22_v0   ;;  %v23_v2 = vld [vmem:[%s518_s1 + $0x4] sm:$0xf]  ;;  %v26_v3 = vld [vmem:[%s518_s1 + $0x18] sm:$0xf] }
   0x3   :  { %v62_v4 = vld [vmem:[%s519_s2] sm:$0xff]  ;;  %vm74_vm0 = vcmask 31744   ;;  %v24_v5 = vld [vmem:[%s518_s1 + $0x8] sm:$0xff]  ;;  %v25_v6 = vld [vmem:[%s518_s1 + $0x10] sm:$0xff]  ;;  %vm27_vm1 = vcmask 257024   ;;  %vm81_vm2 = vcmask 1043456  }
   0x4   :  { %362 = vmatprep.mubr.msk.f32.mxu1 %vm74_vm0, %v62_v4  ;;  %66 = vperm.xlu1 %398, %v24_v5   ;;  %v21_v7 = vld [vmem:[%s517_s0] sm:$0xf]  ;;  %v63_v33 = vld [vmem:[%s519_s2 + $0x8] sm:$0xff]  ;;  %v430_v34 = vmov 0.0|0.0   ;;  %vm431_vm3 = vmmov 0   ;;  %v432_v35 = vmov 0.0  }
   0x5   :  { %v28_v8 = vsel %vm27_vm1, %v21_v7, 0.0  ;;  %386 = vmatprep.subr.bf16.mxu0 %v430_v34  ;;  %380 = vmatprep.mubr.msk.f32.mxu0 %vm431_vm3, %v432_v35  ;;  %v250_v36 = vld [vmem:[%s521_s4] sm:$0xff]  ;;  %v251_v37 = vld [vmem:[%s521_s4 + $0x8] sm:$0xff]  ;;  %vm176_vm4 = vcmask 130048   ;;  %v252_v57 = vld [vmem:[%s521_s4 + $0x10] sm:$0xff]  ;;  %vm254_vm5 = vcmask 261120  }
   0x6   :  { %58 = vperm.xlu0 %397, %v23_v2   ;;  %v29_v9 = vrot.slane %v28_v8, 4  ;;  %v387_v38 = vpack.c.bf16 %v251_v37, %v250_v36  ;;  %v170_v56 = vld [vmem:[%s520_s3] sm:$0xf]  ;;  %v253_v58 = vld [vmem:[%s521_s4 + $0x18] sm:$0xff]  ;;  %s433_s16 = smov [#allocation2]   ;;  %vm328_vm6 = vcmask 125952  }
   0x7   :  { %v390_v59 = vpack.c.bf16 %v253_v58, %v252_v57  ;;  %s336_s3 = sshll.u32 %s433_s16, 4  ;;  %s337_s3 = int_to_ptr.vmem [resolvable:$true] %s336_s3 }
   0x8   :  { %71 = vperm.xlu1 %398, %v25_v6   ;;  %v30_v10 = vadd.f32 %v29_v9, %v28_v8  ;;  %388 = vmatpush3.bf16.msra.mxu0 %v387_v38  ;;  %s405_s17 = scalar_lea.vmem %s337_s3, 64  ;;  %p410_p1 = scmp.lt.s32.totalorder %s337_s3, %s337_s3 }
   0x9   :  { %389 = vmatprep.subr.bf16.mxu0 %v430_v34  ;;  %p406_p0 = scmp.ne.s32.totalorder %s337_s3, %s405_s17  ;;  %p411_p2 = scmp.lt.s32.totalorder %s405_s17, %s405_s17 }
   0xa   :  { %173 = vperm.xlu0 %397, %v26_v3   ;;  %v31_v11 = vrot.slane %v30_v10, 2 }
   0xb   :  { %p412_p3 = por %p411_p2, %p410_p1 }
   0xc   :  { %v32_v12 = vadd.f32 %v31_v11, %v30_v10  ;;  %391 = vmatpush3.bf16.msra.mxu0 %v390_v59 }
   0xd   :  { %p413_p4 = pnand %p412_p3, %p406_p0 }
   0xe   :  { %v33_v13 = vrot.slane %v32_v12, 1 }
  0x10   :  { %v34_v14 = vadd.f32 %v33_v13, %v32_v12 }
  0x12   :  { %v36_v15 = vmul.f32 0.25, %v34_v14 }
  0x14   :  { %v37_v16 = vsub.f32 %v21_v7, %v36_v15 }
  0x16   :  { %v38_v17 = vmul.f32 %v37_v16, %v37_v16 }
  0x18   :  { %v39_v18 = vsel %vm27_vm1, %v38_v17, 0.0 }
  0x19   :  { %v40_v19 = vrot.slane %v39_v18, 4 }
  0x1b   :  { %v41_v20 = vadd.f32 %v40_v19, %v39_v18 }
  0x1d   :  { %v42_v21 = vrot.slane %v41_v20, 2 }
  0x1f   :  { %v43_v22 = vadd.f32 %v42_v21, %v41_v20 }
  0x21   :  { %v44_v23 = vrot.slane %v43_v22, 1 }
  0x23   :  { %v45_v24 = vadd.f32 %v44_v23, %v43_v22 }
  0x25   :  { %v46_v25 = vmul.f32 0.25, %v45_v24 }
  0x27   :  { %v47_v26 = vadd.f32 1e-06, %v46_v25 }
  0x29   :  { %399 = vrsqrt.f32 %v47_v26 }
  0x33   :  { %v400_v27 = vpop.eup %399 }
  0x34   :  { %v49_v28 = vmul.f32 %v400_v27, %v37_v16 }
  0x81   :  { %v53_v29 = vpop.permute.xlu0 %52 }
  0x82   :  { %v55_v30 = vmul.f32 %v53_v29, %v49_v28 }
  0x83   :  { %v67_v39 = vpop.permute.xlu1 %66 }
  0x85   :  { %v59_v31 = vpop.permute.xlu0 %58 }
  0x86   :  { %v61_v32 = vadd.f32 %v59_v31, %v55_v30 }
  0x87   :  { %v72_v40 = vpop.permute.xlu1 %71 }
  0x88   :  { %360 = vmatprep.subr.msk.mxu1 %vm81_vm2, %v61_v32 }
  0x89   :  { %361 = vmatpush3.msk.msra.mxu1 %vm81_vm2, %v61_v32  ;;  %v174_v60 = vpop.permute.xlu0 %173 }
  0x8a   :  { %363 = vmatmul.mubr.msk.f32.vlgmr.msra.gmra.mrb[0].mxu1 %vm74_vm0, %v63_v33  ;;  %383 = vmatprep.subr.bf16.mxu1 %v430_v34 }
  0x8b   :  { %369 = vmatprep.mubr.msk.f32.mxu1 %vm431_vm3, %v432_v35 }
 0x15d   :  { %v364_v41 = vpop.f32.mrb[0].mxu1 }
 0x15e   :  { %v157_v42 = vadd.f32 %v364_v41, %v72_v40  ;;  %v151_v43 = vpop.f32.mrb[1].mxu1 }
 0x15f   :  { %v152_v44 = vadd.f32 %v151_v43, %v67_v39 }
 0x160   :  { %v163_v45 = vmul.f32 0.70710677, %v157_v42  ;;  %v161_v49 = vmul.f32 0.5, %v157_v42 }
 0x161   :  { %v162_v46 = vmul.f32 0.70710677, %v152_v44  ;;  %v160_v51 = vmul.f32 0.5, %v152_v44 }
 0x162   :  { %401 = verf.f32 %v163_v45 }
 0x163   :  { %403 = verf.f32 %v162_v46 }
 0x16c   :  { %v402_v47 = vpop.eup %401 }
 0x16d   :  { %v404_v48 = vpop.eup %403  ;;  %v167_v50 = vadd.f32 1.0, %v402_v47 }
 0x16e   :  { %v166_v52 = vadd.f32 1.0, %v404_v48 }
 0x16f   :  { %v169_v53 = vmul.f32 %v167_v50, %v161_v49 }
 0x170   :  { %v168_v54 = vmul.f32 %v166_v52, %v160_v51 }
 0x172   :  { %v384_v55 = vpack.c.bf16 %v169_v53, %v168_v54 }
 0x174   :  { %385 = vmatpush3.bf16.msra.mxu1 %v384_v55 }
 0x177   :  { %370 = vmatmul.mubr.msk.f32.vlgmr.msra.gmra.mrb[2].mxu1 %vm176_vm4, %v170_v56 }
 0x24a   :  { %v246_v61 = vpop.f32.mrb[2].mxu1 }
 0x24b   :  { %v247_v62 = vadd.f32 %v246_v61, %v174_v60  ;;  %v371_v63 = vpop.f32.mrb[3].mxu1 }
 0x24d   :  { %381 = vmatmul.mubr.msk.f32.vlgmr.msra.gmra.mrb[0].mxu0 %vm254_vm5, %v247_v62 }
 0x320   :  { %v324_v0 = vpop.f32.mrb[0].mxu0 }
 0x321   :  { %329 = vst.msk [vmem:[#allocation2] sm:$0xf] %vm328_vm6, %v324_v0  ;;  %v382_v1 = vpop.f32.mrb[1].mxu0 }
 0x322   :  { %416 = shalt.err (!%p413_p4)
}
 0x323   :  { %s417_s19 = scalar_lea.hbm %s522_s5, 64 }
 0x324   :  { %p418_p5 = scmp.ne.s32.totalorder %s522_s5, %s417_s19  ;;  %p421_p6 = scmp.lt.u32.totalorder %s417_s19, %s522_s5 }
 0x326   :  { %p423_p7 = pnand %p421_p6, %p418_p5 }
 0x328   :  { %426 = shalt.err (!%p423_p7)
}
 0x329   :  { %339 = dma.vmem_to_hbm [thread:$0]  %s337_s3, 64, %s522_s5, [#allocation3]  }
 0x32a   :  { %427 = dma.done.wait [#allocation3], 64  }
 0x32b   :  { %428 = vsyncadd [#allocation3], 4294967232 }
 0x32c   :  { %343 = vsyncpa [#allocation3], 1 }

</bundles_post_ra>
